<compile_context>
chip_gen: v7x
topology: tpu7x:2x2x1
jax: 0.10.0
libtpu: 0.0.40
codegen_flags: <defaults>
</compile_context>

<pallas_src>
import functools

import jax
import jax.numpy as jnp
from jax.experimental import pallas as pl
from jax.experimental.pallas import tpu as pltpu

ALPHA = 0.25
GAMMA = 2.0            # module default; gamma==2 specializes pow -> multiply
SMOOTH = 1.0
LANES = 128
TILE_ROWS_MAX = 8192   # (8192,128) f32 = 4 MiB per input block
VMEM_LIMIT_BYTES = 32 * 1024 * 1024  # 2 inputs x 2 buffers x 4 MiB + headroom


def _num_tensorcores() -> int:
    """2 on megacore chips (v4 / v5p / v7x), 1 on v5e / v6e.  Safe default 1."""
    try:
        kind = jax.devices()[0].device_kind.lower()
    except Exception:
        return 1
    return 2 if any(tag in kind for tag in ("v7", "tpu7", "v4", "v5p")) else 1


def _hybrid_loss_kernel(pred_ref, target_ref, out_ref,
                        f_acc, i_acc, p_acc, t_acc,
                        *, total_rows, chunks_per_core, tile_rows, gamma):
    core = pl.program_id(0)
    step = pl.program_id(1)

    @pl.when(step == 0)
    def _():
        f_acc[...] = jnp.zeros_like(f_acc)
        i_acc[...] = jnp.zeros_like(i_acc)
        p_acc[...] = jnp.zeros_like(p_acc)
        t_acc[...] = jnp.zeros_like(t_acc)

    # Inputs may arrive as bf16 (pred) / bf16-int8 (target); cast in-kernel so
    # the HBM stream stays narrow.
    x = pred_ref[...].astype(jnp.float32)
    t = target_ref[...].astype(jnp.float32)

    # Numerically-stable BCE-with-logits; exp(-|x|) is shared with sigmoid.
    e = jnp.exp(-jnp.abs(x))
    bce = jnp.maximum(x, 0.0) - x * t + jnp.log1p(e)
    inv = pl.reciprocal(1.0 + e, approx=True)     # EUP recip, no Newton VALU ops
    sig = jnp.where(x >= 0.0, inv, e * inv)       # sigmoid(x)
    pt = jnp.exp(-bce)                            # matches torch: pt = exp(-bce)
    one_m_pt = 1.0 - pt
    if gamma == 2:                                # static specialization
        focal = one_m_pt * one_m_pt * bce         # ALPHA applied in the epilogue
    else:
        focal = one_m_pt ** gamma * bce

    groups = tile_rows // 8

    def accumulate(focal_v, inter_v, sig_v, t_v):
        # (tile_rows,128) -> (groups,8,128); summing over axis 0 is pure
        # vreg-to-vreg VALU adds — no per-step cross-sublane (XLU) collapse.
        f_acc[...] += jnp.sum(focal_v.reshape(groups, 8, LANES), axis=0)
        i_acc[...] += jnp.sum(inter_v.reshape(groups, 8, LANES), axis=0)
        p_acc[...] += jnp.sum(sig_v.reshape(groups, 8, LANES), axis=0)
        t_acc[...] += jnp.sum(t_v.reshape(groups, 8, LANES), axis=0)

    # Row-granular validity (the wrapper only ever feeds full 128-lane rows),
    # computed from the *logical* chunk index.  Row arithmetic stays safely in
    # int32 for inputs up to ~2.7e11 elements.
    logical_chunk = core * chunks_per_core + step
    rows_left = total_rows - logical_chunk * tile_rows

    @pl.when(rows_left >= tile_rows)
    def _():                                      # fast path: fully valid tile
        accumulate(focal, sig * t, sig, t)

    @pl.when(rows_left < tile_rows)
    def _():                                      # ragged tail / clamped dup
        row_ids = jax.lax.broadcasted_iota(jnp.int32, (tile_rows, LANES), 0)
        valid = row_ids < rows_left
        # where-select (not multiply) so OOB garbage can't poison sums via NaN.
        sig_m = jnp.where(valid, sig, 0.0)
        t_m = jnp.where(valid, t, 0.0)
        accumulate(jnp.where(valid, focal, 0.0), sig_m * t_m, sig_m, t_m)

    @pl.when(step == pl.num_programs(1) - 1)
    def _():
        out_ref[0, 0, :, :] = f_acc[...]
        out_ref[0, 1, :, :] = i_acc[...]
        out_ref[0, 2, :, :] = p_acc[...]
        out_ref[0, 3, :, :] = t_acc[...]


def _kernel_partial_sums(p2, t2, rows, gamma):
    """Run the Pallas kernel on a (rows, 128) slab; return 4 partial sums."""
    num_cores = _num_tensorcores()
    tile_rows = max(8, (min(TILE_ROWS_MAX, rows) // 8) * 8)   # <= rows, %8 == 0
    num_chunks = pl.cdiv(rows, tile_rows)
    chunks_per_core = pl.cdiv(num_chunks, num_cores)
    max_block = num_chunks - 1

    # Clamp the DMA block index into bounds; out-of-range logical chunks are
    # fully masked inside the kernel so the duplicated reads contribute zero.
    def in_map(c, i):
        return (jnp.minimum(c * chunks_per_core + i, max_block), 0)

    in_spec = pl.BlockSpec((tile_rows, LANES), in_map)

    kernel = functools.partial(
        _hybrid_loss_kernel,
        total_rows=rows, chunks_per_core=chunks_per_core,
        tile_rows=tile_rows, gamma=gamma)

    partials = pl.pallas_call(
        kernel,
        out_shape=jax.ShapeDtypeStruct((num_cores, 4, 8, LANES), jnp.float32),
        grid_spec=pltpu.PrefetchScalarGridSpec(
            num_scalar_prefetch=0,
            grid=(num_cores, chunks_per_core),
            in_specs=[in_spec, in_spec],
            out_specs=pl.BlockSpec((1, 4, 8, LANES), lambda c, i: (c, 0, 0, 0)),
            scratch_shapes=[pltpu.VMEM((8, LANES), jnp.float32)] * 4,
        ),
        # TODO(synk): confirm on a v7x profile that the leading "parallel" axis
        # actually shards across both TensorCores; switch to pltpu.CORE_PARALLEL
        # if it does not.
        compiler_params=pltpu.CompilerParams(
            dimension_semantics=("parallel", "arbitrary"),
            vmem_limit_bytes=VMEM_LIMIT_BYTES),
    )(p2, t2)

    # Tiny epilogue reduce: per-core, per-sublane, per-lane partial sums.
    return jnp.sum(partials, axis=(0, 2, 3))      # [focal, inter, pred_s, tgt_s]


def _jax_partial_sums(pred_flat, target_flat, gamma):
    """Pure-JAX partial sums for the (rare, tiny) lane tail."""
    x = pred_flat.astype(jnp.float32)
    t = target_flat.astype(jnp.float32)
    bce = jnp.maximum(x, 0.0) - x * t + jnp.log1p(jnp.exp(-jnp.abs(x)))
    pt = jnp.exp(-bce)
    focal = (1.0 - pt) ** gamma * bce
    sig = jax.nn.sigmoid(x)
    return jnp.stack([jnp.sum(focal), jnp.sum(sig * t), jnp.sum(sig), jnp.sum(t)])


def hybrid_loss(pred, target, *, alpha=ALPHA, gamma=GAMMA, smooth=SMOOTH):
    """Pallas TPU implementation of HybridLoss.forward(pred, target)."""
    assert pred.shape == target.shape
    n_elems = pred.size
    flat_p = pred.reshape(-1)
    flat_t = target.reshape(-1)

    rem = n_elems % LANES
    main = n_elems - rem
    rows = main // LANES

    sums = jnp.zeros((4,), jnp.float32)
    tail_start = 0
    if rows >= 8:
        # No host-side padding: the (rows,128) reshape is free when rem == 0
        # (typical NCHW); any <128-element tail is handled in JAX below.
        p2 = (flat_p if rem == 0 else flat_p[:main]).reshape(rows, LANES)
        t2 = (flat_t if rem == 0 else flat_t[:main]).reshape(rows, LANES)
        sums = sums + _kernel_partial_sums(p2, t2, rows, gamma)
        tail_start = main
    if tail_start < n_elems:
        sums = sums + _jax_partial_sums(flat_p[tail_start:], flat_t[tail_start:],
                                        gamma)

    focal_mean = alpha * sums[0] / jnp.float32(n_elems)
    dice = (2.0 * sums[1] + smooth) / (sums[2] + sums[3] + smooth)
    return 0.5 * focal_mean + 0.5 * (1.0 - dice)


def hybrid_loss_ref(pred, target, alpha=ALPHA, gamma=GAMMA, smooth=SMOOTH):
    """Pure-JAX reference mirroring the PyTorch module exactly."""
    x = pred.astype(jnp.float32)
    t = target.astype(jnp.float32)
    bce = jnp.maximum(x, 0.0) - x * t + jnp.log1p(jnp.exp(-jnp.abs(x)))
    pt = jnp.exp(-bce)
    focal = alpha * (1.0 - pt) ** gamma * bce
    sig = jax.nn.sigmoid(x)
    inter = jnp.sum(sig * t)
    dice = (2.0 * inter + smooth) / (jnp.sum(sig) + jnp.sum(t) + smooth)
    return 0.5 * jnp.mean(focal) + 0.5 * (1.0 - dice)


if __name__ == "__main__":
    key = jax.random.PRNGKey(0)
    k1, k2 = jax.random.split(key)
    # NCHW logits and binary targets, as the PyTorch module would receive.
    pred = jax.random.normal(k1, (2, 4, 16, 16), dtype=jnp.float32)
    target = (jax.random.uniform(k2, (2, 4, 16, 16)) > 0.5).astype(jnp.float32)

    loss = jax.block_until_ready(hybrid_loss(pred, target))
    ref = jax.block_until_ready(hybrid_loss_ref(pred, target))
    assert jnp.allclose(loss, ref, rtol=1e-3, atol=1e-3), (loss, ref)
    print("KERNEL_OK")
</pallas_src>

<mosaic_0001>
module attributes {stable_mosaic.version = 11 : i64} {
  func.func @_hybrid_loss_kernel(%arg0: i32, %arg1: i32, %arg2: memref<16x128xf32, #tpu.memory_space<vmem>>, %arg3: memref<16x128xf32, #tpu.memory_space<vmem>>, %arg4: memref<1x4x8x128xf32, #tpu.memory_space<vmem>>, %arg5: memref<8x128xf32, #tpu.memory_space<vmem>>, %arg6: memref<8x128xf32, #tpu.memory_space<vmem>>, %arg7: memref<8x128xf32, #tpu.memory_space<vmem>>, %arg8: memref<8x128xf32, #tpu.memory_space<vmem>>) attributes {dimension_semantics = [#tpu.dimension_semantics<parallel>, #tpu.dimension_semantics<arbitrary>], iteration_bounds = array<i64: 1, 1>, scalar_prefetch = 0 : i64, scratch_operands = 4 : i64, tpu.core_type = #tpu.core_type<tc>, window_params = [{transform_indices = @transform_0, window_bounds = array<i64: 16, 128>}, {transform_indices = @transform_1, window_bounds = array<i64: 16, 128>}, {transform_indices = @transform_2, window_bounds = array<i64: 1, 4, 8, 128>}]} {
    %c0_i32 = arith.constant 0 : i32
    %0 = arith.cmpi eq, %arg1, %c0_i32 : i32
    %1 = arith.extui %0 : i1 to i32
    %c0_i32_0 = arith.constant 0 : i32
    %2 = arith.cmpi ne, %1, %c0_i32_0 : i32
    scf.if %2 {
      %cst_16 = arith.constant 0.000000e+00 : f32
      %42 = vector.broadcast %cst_16 : f32 to vector<8x128xf32>
      %c0_17 = arith.constant 0 : index
      %c0_18 = arith.constant 0 : index
      %43 = vector.load %arg5[%c0_17, %c0_18] : memref<8x128xf32, #tpu.memory_space<vmem>>, vector<8x128xf32>
      tpu.vector_store %arg5[%c0_17, %c0_18], %42 {strides = array<i32>} : memref<8x128xf32, #tpu.memory_space<vmem>>, vector<8x128xf32>,
      %cst_19 = arith.constant 0.000000e+00 : f32
      %44 = vector.broadcast %cst_19 : f32 to vector<8x128xf32>
      %c0_20 = arith.constant 0 : index
      %c0_21 = arith.constant 0 : index
      %45 = vector.load %arg6[%c0_20, %c0_21] : memref<8x128xf32, #tpu.memory_space<vmem>>, vector<8x128xf32>
      tpu.vector_store %arg6[%c0_20, %c0_21], %44 {strides = array<i32>} : memref<8x128xf32, #tpu.memory_space<vmem>>, vector<8x128xf32>,
      %cst_22 = arith.constant 0.000000e+00 : f32
      %46 = vector.broadcast %cst_22 : f32 to vector<8x128xf32>
      %c0_23 = arith.constant 0 : index
      %c0_24 = arith.constant 0 : index
      %47 = vector.load %arg7[%c0_23, %c0_24] : memref<8x128xf32, #tpu.memory_space<vmem>>, vector<8x128xf32>
      tpu.vector_store %arg7[%c0_23, %c0_24], %46 {strides = array<i32>} : memref<8x128xf32, #tpu.memory_space<vmem>>, vector<8x128xf32>,
      %cst_25 = arith.constant 0.000000e+00 : f32
      %48 = vector.broadcast %cst_25 : f32 to vector<8x128xf32>
      %c0_26 = arith.constant 0 : index
      %c0_27 = arith.constant 0 : index
      %49 = vector.load %arg8[%c0_26, %c0_27] : memref<8x128xf32, #tpu.memory_space<vmem>>, vector<8x128xf32>
      tpu.vector_store %arg8[%c0_26, %c0_27], %48 {strides = array<i32>} : memref<8x128xf32, #tpu.memory_space<vmem>>, vector<8x128xf32>,
    } else {
    }
    %c0 = arith.constant 0 : index
    %c0_1 = arith.constant 0 : index
    %3 = vector.load %arg2[%c0, %c0_1] : memref<16x128xf32, #tpu.memory_space<vmem>>, vector<16x128xf32>
    %c0_2 = arith.constant 0 : index
    %c0_3 = arith.constant 0 : index
    %4 = vector.load %arg3[%c0_2, %c0_3] : memref<16x128xf32, #tpu.memory_space<vmem>>, vector<16x128xf32>
    %5 = math.absf %3 : vector<16x128xf32>
    %cst = arith.constant 0.000000e+00 : f32
    %6 = vector.broadcast %cst : f32 to vector<16x128xf32>
    %7 = arith.subf %6, %5 : vector<16x128xf32>
    %8 = math.exp %7 : vector<16x128xf32>
    %cst_4 = arith.constant 0.000000e+00 : f32
    %9 = vector.broadcast %cst_4 : f32 to vector<16x128xf32>
    %10 = arith.maximumf %3, %9 : vector<16x128xf32>
    %11 = arith.mulf %3, %4 : vector<16x128xf32>
    %12 = arith.subf %10, %11 : vector<16x128xf32>
    %13 = math.log1p %8 : vector<16x128xf32>
    %14 = arith.addf %12, %13 : vector<16x128xf32>
    %cst_5 = arith.constant 1.000000e+00 : f32
    %15 = vector.broadcast %cst_5 : f32 to vector<16x128xf32>
    %16 = arith.addf %15, %8 : vector<16x128xf32>
    %17 = tpu.reciprocal %16 {approx = true} : vector<16x128xf32> -> vector<16x128xf32>
    %cst_6 = arith.constant 0.000000e+00 : f32
    %18 = vector.broadcast %cst_6 : f32 to vector<16x128xf32>
    %19 = arith.cmpf oge, %3, %18 : vector<16x128xf32>
    %20 = arith.mulf %8, %17 : vector<16x128xf32>
    %21 = arith.select %19, %17, %20 : vector<16x128xi1>, vector<16x128xf32>
    %cst_7 = arith.constant 0.000000e+00 : f32
    %22 = vector.broadcast %cst_7 : f32 to vector<16x128xf32>
    %23 = arith.subf %22, %14 : vector<16x128xf32>
    %24 = math.exp %23 : vector<16x128xf32>
    %cst_8 = arith.constant 1.000000e+00 : f32
    %25 = vector.broadcast %cst_8 : f32 to vector<16x128xf32>
    %26 = arith.subf %25, %24 : vector<16x128xf32>
    %27 = arith.mulf %26, %26 : vector<16x128xf32>
    %28 = arith.mulf %27, %14 : vector<16x128xf32>
    %c1_i32 = arith.constant 1 : i32
    %29 = arith.muli %arg0, %c1_i32 : i32
    %30 = arith.addi %29, %arg1 : i32
    %c16_i32 = arith.constant 16 : i32
    %31 = arith.muli %30, %c16_i32 : i32
    %c16_i32_9 = arith.constant 16 : i32
    %32 = arith.subi %c16_i32_9, %31 : i32
    %c16_i32_10 = arith.constant 16 : i32
    %33 = arith.cmpi sge, %32, %c16_i32_10 : i32
    %34 = arith.extui %33 : i1 to i32
    %c0_i32_11 = arith.constant 0 : i32
    %35 = arith.cmpi ne, %34, %c0_i32_11 : i32
    scf.if %35 {
      %42 = arith.mulf %21, %4 : vector<16x128xf32>
      %c0_16 = arith.constant 0 : index
      %c0_17 = arith.constant 0 : index
      %43 = vector.load %arg5[%c0_16, %c0_17] : memref<8x128xf32, #tpu.memory_space<vmem>>, vector<8x128xf32>
      %44 = vector.shape_cast %28 : vector<16x128xf32> to vector<2x8x128xf32>
      %cst_18 = arith.constant dense<0.000000e+00> : vector<8x128xf32>
      %45 = vector.multi_reduction <add>, %44, %cst_18 [0] : vector<2x8x128xf32> to vector<8x128xf32>
      %46 = arith.addf %43, %45 : vector<8x128xf32>
      %c0_19 = arith.constant 0 : index
      %c0_20 = arith.constant 0 : index
      %47 = vector.load %arg5[%c0_19, %c0_20] : memref<8x128xf32, #tpu.memory_space<vmem>>, vector<8x128xf32>
      tpu.vector_store %arg5[%c0_19, %c0_20], %46 {strides = array<i32>} : memref<8x128xf32, #tpu.memory_space<vmem>>, vector<8x128xf32>,
      %c0_21 = arith.constant 0 : index
      %c0_22 = arith.constant 0 : index
      %48 = vector.load %arg6[%c0_21, %c0_22] : memref<8x128xf32, #tpu.memory_space<vmem>>, vector<8x128xf32>
      %49 = vector.shape_cast %42 : vector<16x128xf32> to vector<2x8x128xf32>
      %cst_23 = arith.constant dense<0.000000e+00> : vector<8x128xf32>
      %50 = vector.multi_reduction <add>, %49, %cst_23 [0] : vector<2x8x128xf32> to vector<8x128xf32>
      %51 = arith.addf %48, %50 : vector<8x128xf32>
      %c0_24 = arith.constant 0 : index
      %c0_25 = arith.constant 0 : index
      %52 = vector.load %arg6[%c0_24, %c0_25] : memref<8x128xf32, #tpu.memory_space<vmem>>, vector<8x128xf32>
      tpu.vector_store %arg6[%c0_24, %c0_25], %51 {strides = array<i32>} : memref<8x128xf32, #tpu.memory_space<vmem>>, vector<8x128xf32>,
      %c0_26 = arith.constant 0 : index
      %c0_27 = arith.constant 0 : index
      %53 = vector.load %arg7[%c0_26, %c0_27] : memref<8x128xf32, #tpu.memory_space<vmem>>, vector<8x128xf32>
      %54 = vector.shape_cast %21 : vector<16x128xf32> to vector<2x8x128xf32>
      %cst_28 = arith.constant dense<0.000000e+00> : vector<8x128xf32>
      %55 = vector.multi_reduction <add>, %54, %cst_28 [0] : vector<2x8x128xf32> to vector<8x128xf32>
      %56 = arith.addf %53, %55 : vector<8x128xf32>
      %c0_29 = arith.constant 0 : index
      %c0_30 = arith.constant 0 : index
      %57 = vector.load %arg7[%c0_29, %c0_30] : memref<8x128xf32, #tpu.memory_space<vmem>>, vector<8x128xf32>
      tpu.vector_store %arg7[%c0_29, %c0_30], %56 {strides = array<i32>} : memref<8x128xf32, #tpu.memory_space<vmem>>, vector<8x128xf32>,
      %c0_31 = arith.constant 0 : index
      %c0_32 = arith.constant 0 : index
      %58 = vector.load %arg8[%c0_31, %c0_32] : memref<8x128xf32, #tpu.memory_space<vmem>>, vector<8x128xf32>
      %59 = vector.shape_cast %4 : vector<16x128xf32> to vector<2x8x128xf32>
      %cst_33 = arith.constant dense<0.000000e+00> : vector<8x128xf32>
      %60 = vector.multi_reduction <add>, %59, %cst_33 [0] : vector<2x8x128xf32> to vector<8x128xf32>
      %61 = arith.addf %58, %60 : vector<8x128xf32>
      %c0_34 = arith.constant 0 : index
      %c0_35 = arith.constant 0 : index
      %62 = vector.load %arg8[%c0_34, %c0_35] : memref<8x128xf32, #tpu.memory_space<vmem>>, vector<8x128xf32>
      tpu.vector_store %arg8[%c0_34, %c0_35], %61 {strides = array<i32>} : memref<8x128xf32, #tpu.memory_space<vmem>>, vector<8x128xf32>,
    } else {
    }
    %c16_i32_12 = arith.constant 16 : i32
    %36 = arith.cmpi slt, %32, %c16_i32_12 : i32
    %37 = arith.extui %36 : i1 to i32
    %c0_i32_13 = arith.constant 0 : i32
    %38 = arith.cmpi ne, %37, %c0_i32_13 : i32
    scf.if %38 {
      %42 = tpu.iota {dimensions = array<i32: 0>} : vector<16x128xi32>
      %43 = vector.broadcast %32 : i32 to vector<16x128xi32>
      %44 = arith.cmpi slt, %42, %43 : vector<16x128xi32>
      %cst_16 = arith.constant 0.000000e+00 : f32
      %45 = vector.broadcast %cst_16 : f32 to vector<16x128xf32>
      %46 = arith.select %44, %21, %45 : vector<16x128xi1>, vector<16x128xf32>
      %cst_17 = arith.constant 0.000000e+00 : f32
      %47 = vector.broadcast %cst_17 : f32 to vector<16x128xf32>
      %48 = arith.select %44, %4, %47 : vector<16x128xi1>, vector<16x128xf32>
      %cst_18 = arith.constant 0.000000e+00 : f32
      %49 = vector.broadcast %cst_18 : f32 to vector<16x128xf32>
      %50 = arith.select %44, %28, %49 : vector<16x128xi1>, vector<16x128xf32>
      %51 = arith.mulf %46, %48 : vector<16x128xf32>
      %c0_19 = arith.constant 0 : index
      %c0_20 = arith.constant 0 : index
      %52 = vector.load %arg5[%c0_19, %c0_20] : memref<8x128xf32, #tpu.memory_space<vmem>>, vector<8x128xf32>
      %53 = vector.shape_cast %50 : vector<16x128xf32> to vector<2x8x128xf32>
      %cst_21 = arith.constant dense<0.000000e+00> : vector<8x128xf32>
      %54 = vector.multi_reduction <add>, %53, %cst_21 [0] : vector<2x8x128xf32> to vector<8x128xf32>
      %55 = arith.addf %52, %54 : vector<8x128xf32>
      %c0_22 = arith.constant 0 : index
      %c0_23 = arith.constant 0 : index
      %56 = vector.load %arg5[%c0_22, %c0_23] : memref<8x128xf32, #tpu.memory_space<vmem>>, vector<8x128xf32>
      tpu.vector_store %arg5[%c0_22, %c0_23], %55 {strides = array<i32>} : memref<8x128xf32, #tpu.memory_space<vmem>>, vector<8x128xf32>,
      %c0_24 = arith.constant 0 : index
      %c0_25 = arith.constant 0 : index
      %57 = vector.load %arg6[%c0_24, %c0_25] : memref<8x128xf32, #tpu.memory_space<vmem>>, vector<8x128xf32>
      %58 = vector.shape_cast %51 : vector<16x128xf32> to vector<2x8x128xf32>
      %cst_26 = arith.constant dense<0.000000e+00> : vector<8x128xf32>
      %59 = vector.multi_reduction <add>, %58, %cst_26 [0] : vector<2x8x128xf32> to vector<8x128xf32>
      %60 = arith.addf %57, %59 : vector<8x128xf32>
      %c0_27 = arith.constant 0 : index
      %c0_28 = arith.constant 0 : index
      %61 = vector.load %arg6[%c0_27, %c0_28] : memref<8x128xf32, #tpu.memory_space<vmem>>, vector<8x128xf32>
      tpu.vector_store %arg6[%c0_27, %c0_28], %60 {strides = array<i32>} : memref<8x128xf32, #tpu.memory_space<vmem>>, vector<8x128xf32>,
      %c0_29 = arith.constant 0 : index
      %c0_30 = arith.constant 0 : index
      %62 = vector.load %arg7[%c0_29, %c0_30] : memref<8x128xf32, #tpu.memory_space<vmem>>, vector<8x128xf32>
      %63 = vector.shape_cast %46 : vector<16x128xf32> to vector<2x8x128xf32>
      %cst_31 = arith.constant dense<0.000000e+00> : vector<8x128xf32>
      %64 = vector.multi_reduction <add>, %63, %cst_31 [0] : vector<2x8x128xf32> to vector<8x128xf32>
      %65 = arith.addf %62, %64 : vector<8x128xf32>
      %c0_32 = arith.constant 0 : index
      %c0_33 = arith.constant 0 : index
      %66 = vector.load %arg7[%c0_32, %c0_33] : memref<8x128xf32, #tpu.memory_space<vmem>>, vector<8x128xf32>
      tpu.vector_store %arg7[%c0_32, %c0_33], %65 {strides = array<i32>} : memref<8x128xf32, #tpu.memory_space<vmem>>, vector<8x128xf32>,
      %c0_34 = arith.constant 0 : index
      %c0_35 = arith.constant 0 : index
      %67 = vector.load %arg8[%c0_34, %c0_35] : memref<8x128xf32, #tpu.memory_space<vmem>>, vector<8x128xf32>
      %68 = vector.shape_cast %48 : vector<16x128xf32> to vector<2x8x128xf32>
      %cst_36 = arith.constant dense<0.000000e+00> : vector<8x128xf32>
      %69 = vector.multi_reduction <add>, %68, %cst_36 [0] : vector<2x8x128xf32> to vector<8x128xf32>
      %70 = arith.addf %67, %69 : vector<8x128xf32>
      %c0_37 = arith.constant 0 : index
      %c0_38 = arith.constant 0 : index
      %71 = vector.load %arg8[%c0_37, %c0_38] : memref<8x128xf32, #tpu.memory_space<vmem>>, vector<8x128xf32>
      tpu.vector_store %arg8[%c0_37, %c0_38], %70 {strides = array<i32>} : memref<8x128xf32, #tpu.memory_space<vmem>>, vector<8x128xf32>,
    } else {
    }
    %c0_i32_14 = arith.constant 0 : i32
    %39 = arith.cmpi eq, %arg1, %c0_i32_14 : i32
    %40 = arith.extui %39 : i1 to i32
    %c0_i32_15 = arith.constant 0 : i32
    %41 = arith.cmpi ne, %40, %c0_i32_15 : i32
    scf.if %41 {
      %c0_16 = arith.constant 0 : index
      %c0_17 = arith.constant 0 : index
      %42 = vector.load %arg5[%c0_16, %c0_17] : memref<8x128xf32, #tpu.memory_space<vmem>>, vector<8x128xf32>
      %c0_18 = arith.constant 0 : index
      %c0_19 = arith.constant 0 : index
      %c0_20 = arith.constant 0 : index
      %c0_21 = arith.constant 0 : index
      %43 = vector.load %arg4[%c0_18, %c0_19, %c0_20, %c0_21] : memref<1x4x8x128xf32, #tpu.memory_space<vmem>>, vector<1x1x8x128xf32>
      %44 = vector.shape_cast %43 : vector<1x1x8x128xf32> to vector<8x128xf32>
      %45 = vector.shape_cast %42 : vector<8x128xf32> to vector<1x1x8x128xf32>
      tpu.vector_store %arg4[%c0_18, %c0_19, %c0_20, %c0_21], %45 {strides = array<i32>} : memref<1x4x8x128xf32, #tpu.memory_space<vmem>>, vector<1x1x8x128xf32>,
      %c0_22 = arith.constant 0 : index
      %c0_23 = arith.constant 0 : index
      %46 = vector.load %arg6[%c0_22, %c0_23] : memref<8x128xf32, #tpu.memory_space<vmem>>, vector<8x128xf32>
      %c0_24 = arith.constant 0 : index
      %c1 = arith.constant 1 : index
      %c0_25 = arith.constant 0 : index
      %c0_26 = arith.constant 0 : index
      %47 = vector.load %arg4[%c0_24, %c1, %c0_25, %c0_26] : memref<1x4x8x128xf32, #tpu.memory_space<vmem>>, vector<1x1x8x128xf32>
      %48 = vector.shape_cast %47 : vector<1x1x8x128xf32> to vector<8x128xf32>
      %49 = vector.shape_cast %46 : vector<8x128xf32> to vector<1x1x8x128xf32>
      tpu.vector_store %arg4[%c0_24, %c1, %c0_25, %c0_26], %49 {strides = array<i32>} : memref<1x4x8x128xf32, #tpu.memory_space<vmem>>, vector<1x1x8x128xf32>,
      %c0_27 = arith.constant 0 : index
      %c0_28 = arith.constant 0 : index
      %50 = vector.load %arg7[%c0_27, %c0_28] : memref<8x128xf32, #tpu.memory_space<vmem>>, vector<8x128xf32>
      %c0_29 = arith.constant 0 : index
      %c2 = arith.constant 2 : index
      %c0_30 = arith.constant 0 : index
      %c0_31 = arith.constant 0 : index
      %51 = vector.load %arg4[%c0_29, %c2, %c0_30, %c0_31] : memref<1x4x8x128xf32, #tpu.memory_space<vmem>>, vector<1x1x8x128xf32>
      %52 = vector.shape_cast %51 : vector<1x1x8x128xf32> to vector<8x128xf32>
      %53 = vector.shape_cast %50 : vector<8x128xf32> to vector<1x1x8x128xf32>
      tpu.vector_store %arg4[%c0_29, %c2, %c0_30, %c0_31], %53 {strides = array<i32>} : memref<1x4x8x128xf32, #tpu.memory_space<vmem>>, vector<1x1x8x128xf32>,
      %c0_32 = arith.constant 0 : index
      %c0_33 = arith.constant 0 : index
      %54 = vector.load %arg8[%c0_32, %c0_33] : memref<8x128xf32, #tpu.memory_space<vmem>>, vector<8x128xf32>
      %c0_34 = arith.constant 0 : index
      %c3 = arith.constant 3 : index
      %c0_35 = arith.constant 0 : index
      %c0_36 = arith.constant 0 : index
      %55 = vector.load %arg4[%c0_34, %c3, %c0_35, %c0_36] : memref<1x4x8x128xf32, #tpu.memory_space<vmem>>, vector<1x1x8x128xf32>
      %56 = vector.shape_cast %55 : vector<1x1x8x128xf32> to vector<8x128xf32>
      %57 = vector.shape_cast %54 : vector<8x128xf32> to vector<1x1x8x128xf32>
      tpu.vector_store %arg4[%c0_34, %c3, %c0_35, %c0_36], %57 {strides = array<i32>} : memref<1x4x8x128xf32, #tpu.memory_space<vmem>>, vector<1x1x8x128xf32>,
    } else {
    }
    return
  }
  func.func @transform_0(%arg0: i32, %arg1: i32) -> (i32, i32) {
    %c1_i32 = arith.constant 1 : i32
    %0 = arith.muli %arg0, %c1_i32 : i32
    %1 = arith.addi %0, %arg1 : i32
    %c0_i32 = arith.constant 0 : i32
    %2 = arith.minsi %1, %c0_i32 : i32
    %c0_i32_0 = arith.constant 0 : i32
    %c0_i32_1 = arith.constant 0 : i32
    return %2, %c0_i32_0 : i32, i32
  }
  func.func @transform_1(%arg0: i32, %arg1: i32) -> (i32, i32) {
    %c1_i32 = arith.constant 1 : i32
    %0 = arith.muli %arg0, %c1_i32 : i32
    %1 = arith.addi %0, %arg1 : i32
    %c0_i32 = arith.constant 0 : i32
    %2 = arith.minsi %1, %c0_i32 : i32
    %c0_i32_0 = arith.constant 0 : i32
    %c0_i32_1 = arith.constant 0 : i32
    return %2, %c0_i32_0 : i32, i32
  }
  func.func @transform_2(%arg0: i32, %arg1: i32) -> (i32, i32, i32, i32) {
    %c0_i32 = arith.constant 0 : i32
    %c0_i32_0 = arith.constant 0 : i32
    %c0_i32_1 = arith.constant 0 : i32
    %c0_i32_2 = arith.constant 0 : i32
    return %arg0, %c0_i32, %c0_i32_0, %c0_i32_1 : i32, i32, i32, i32
  }
}

</mosaic_0001>

<bundles_post_ra>
// kernel: tpu_custom_call.1
= control target key start
LH: loop header
LB: loop body
LE: loop exit
PB: predicated region body
PF: predicated region fallthrough
CT: control target
= control target key end

     0   :  { %7 = vsyncpa [#allocation7], 0  ;;  %s381_s0 = inlined_call_operand.hbm [shape: f32[16,128], index: 0, kind: input, shape index: {}]   ;;  %s382_s1 = inlined_call_operand.hbm [shape: f32[16,128], index: 1, kind: input, shape index: {}]   ;;  %s383_s2 = inlined_call_operand.hbm [shape: f32[1,4,8,128], index: 2, kind: output, shape index: {}]  }
   0x1   :  { %8 = vsyncpa [#allocation10], 0 }
   0x2   :  { %9 = vsyncpa [#allocation8], 0  ;;  %s316_s9 = smov [#allocation6]   ;;  %s244_s13 = scalar_lea.hbm %s381_s0, 256 }
   0x3   :  { %s21_s10 = sshll.u32 %s316_s9, 4  ;;  %p245_p0 = scmp.ne.s32.totalorder %s381_s0, %s244_s13  ;;  %s22_s10 = int_to_ptr.vmem [resolvable:$true] %s21_s10 }
   0x4   :  { %p248_p1 = scmp.lt.u32.totalorder %s244_s13, %s381_s0 }
   0x6   :  { %p250_p2 = pnand %p248_p1, %p245_p0 }
   0x8   :  { %253 = shalt.err (!%p250_p2)
}
   0x9   :  { %s254_s18 = scalar_lea.vmem %s22_s10, 256  ;;  %p259_p4 = scmp.lt.s32.totalorder %s22_s10, %s22_s10 }
   0xa   :  { %p255_p3 = scmp.ne.s32.totalorder %s22_s10, %s254_s18  ;;  %p260_p5 = scmp.lt.s32.totalorder %s254_s18, %s254_s18 }
   0xc   :  { %p261_p6 = por %p260_p5, %p259_p4 }
   0xe   :  { %p262_p7 = pnand %p261_p6, %p255_p3 }
  0x10   :  { %265 = shalt.err (!%p262_p7)
}
  0x11   :  { %s317_s19 = smov 128   ;;  %s318_s20 = smov 8  }
  0x12   :  { %27 = dma.hbm_to_vmem [thread:$0]  %s381_s0, 256, %s22_s10, [#allocation7], %s317_s19, %s317_s19, %s318_s20  }
  0x13   :  { %s319_s23 = smov [#allocation9]   ;;  %s266_s27 = scalar_lea.hbm %s382_s1, 256 }
  0x14   :  { %s39_s24 = sshll.u32 %s319_s23, 4  ;;  %p267_p8 = scmp.ne.s32.totalorder %s382_s1, %s266_s27  ;;  %s40_s24 = int_to_ptr.vmem [resolvable:$true] %s39_s24 }
  0x15   :  { %p270_p9 = scmp.lt.u32.totalorder %s266_s27, %s382_s1 }
  0x17   :  { %p272_p10 = pnand %p270_p9, %p267_p8 }
  0x19   :  { %275 = shalt.err (!%p272_p10)
}
  0x1a   :  { %s276_s4 = scalar_lea.vmem %s40_s24, 256  ;;  %p281_p12 = scmp.lt.s32.totalorder %s40_s24, %s40_s24 }
  0x1b   :  { %p277_p11 = scmp.ne.s32.totalorder %s40_s24, %s276_s4  ;;  %p282_p13 = scmp.lt.s32.totalorder %s276_s4, %s276_s4 }
  0x1d   :  { %p283_p0 = por %p282_p13, %p281_p12 }
  0x1f   :  { %p284_p1 = pnand %p283_p0, %p277_p11 }
  0x21   :  { %287 = shalt.err (!%p284_p1)
}
  0x22   :  { %45 = dma.hbm_to_vmem [thread:$0]  %s382_s1, 256, %s40_s24, [#allocation10], %s317_s19, %s317_s19, %s318_s20  }
  0x23   :  { %310 = dma.done.wait [#allocation7], 256  }
  0x24   :  { %311 = vsyncadd [#allocation7], 4294967040 }
  0x25   :  { %312 = dma.done.wait [#allocation10], 256  }
  0x26   :  { %313 = vsyncadd [#allocation10], 4294967040  ;;  %v68_v0 = vld [vmem:[#allocation6] sm:$0xff]  ;;  %v69_v1 = vld [vmem:[#allocation6 + $0x8] sm:$0xff]  ;;  %s320_s1 = smov [#allocation11]  }
  0x27   :  { %v72_v2 = vand.u32 2147483647, %v68_v0  ;;  %v73_v3 = vand.u32 2147483647, %v69_v1  ;;  %v70_v4 = vld [vmem:[#allocation9] sm:$0xff]  ;;  %v71_v5 = vld [vmem:[#allocation9 + $0x8] sm:$0xff] }
  0x28   :  { %v150_v8 = vadd.f32 %v71_v5, %v70_v4  ;;  %v80_v18 = vmax.f32 %v68_v0, 0.0  ;;  %v82_v19 = vmul.f32 %v70_v4, %v68_v0  ;;  %v81_v22 = vmax.f32 %v69_v1, 0.0  ;;  %s206_s6 = sshll.u32 %s320_s1, 4  ;;  %s207_s6 = int_to_ptr.vmem [resolvable:$true] %s206_s6 }
  0x29   :  { %v74_v6 = vsub.f32 0.0, %v72_v2  ;;  %v75_v7 = vsub.f32 0.0, %v73_v3  ;;  %v83_v23 = vmul.f32 %v71_v5, %v69_v1  ;;  %vm110_vm2 = vcmp.ge.f32.partialorder %v68_v0, 0.0  ;;  %s288_s7 = scalar_lea.vmem %s207_s6, 512  ;;  %p293_p3 = scmp.lt.s32.totalorder %s207_s6, %s207_s6 }
  0x2a   :  { %200 = vst [vmem:[#allocation11 + $0x18] sm:$0xff] %v150_v8  ;;  %v84_v27 = vsub.f32 %v80_v18, %v82_v19  ;;  %vm111_vm3 = vcmp.ge.f32.partialorder %v69_v1, 0.0  ;;  %p289_p2 = scmp.ne.s32.totalorder %s207_s6, %s288_s7  ;;  %p294_p4 = scmp.lt.s32.totalorder %s288_s7, %s288_s7 }
  0x2b   :  { %v76_v9 = vmul.f32 1.442695, %v74_v6  ;;  %v78_v10 = vmul.f32 1.442695, %v75_v7  ;;  %v85_v30 = vsub.f32 %v81_v22, %v83_v23 }
  0x2c   :  { %p295_p5 = por %p294_p4, %p293_p3 }
  0x2d   :  { %228 = vpow2.f32 %v76_v9 }
  0x2e   :  { %230 = vpow2.f32 %v78_v10  ;;  %p296_p6 = pnand %p295_p5, %p289_p2 }
  0x37   :  { %v229_v11 = vpop.eup %228 }
  0x38   :  { %v231_v12 = vpop.eup %230  ;;  %v86_v13 = vadd.f32 1.0, %v229_v11  ;;  %v89_v15 = vmul.f32 -0.5, %v229_v11  ;;  %v92_v20 = vand.u32 2147483647, %v229_v11 }
  0x39   :  { %v95_v14 = vadd.f32 1.0, %v231_v12  ;;  %v98_v16 = vmul.f32 -0.5, %v231_v12  ;;  %v101_v24 = vand.u32 2147483647, %v231_v12 }
  0x3a   :  { %232 = vlog2.f32 %v86_v13  ;;  %v90_v17 = vadd.f32 1.0, %v89_v15  ;;  %vm93_vm0 = vcmp.lt.f32.partialorder %v92_v20, 0.0004427343 }
  0x3b   :  { %234 = vlog2.f32 %v95_v14  ;;  %v99_v21 = vadd.f32 1.0, %v98_v16  ;;  %vm102_vm1 = vcmp.lt.f32.partialorder %v101_v24, 0.0004427343 }
  0x3c   :  { %236 = vrcp.f32 %v86_v13  ;;  %v91_v25 = vmul.f32 %v229_v11, %v90_v17 }
  0x3d   :  { %238 = vrcp.f32 %v95_v14  ;;  %v100_v28 = vmul.f32 %v231_v12, %v99_v21 }
  0x44   :  { %v233_v26 = vpop.eup %232 }
  0x45   :  { %v235_v29 = vpop.eup %234  ;;  %v88_v31 = vmul.f32 0.6931472, %v233_v26 }
  0x46   :  { %v237_v32 = vpop.eup %236  ;;  %v97_v33 = vmul.f32 0.6931472, %v235_v29 }
  0x47   :  { %v239_v34 = vpop.eup %238  ;;  %v94_v35 = vsel %vm93_vm0, %v91_v25, %v88_v31  ;;  %v112_v36 = vmul.f32 %v237_v32, %v229_v11 }
  0x48   :  { %v103_v37 = vsel %vm102_vm1, %v100_v28, %v97_v33  ;;  %v104_v38 = vadd.f32 %v94_v35, %v84_v27  ;;  %v113_v39 = vmul.f32 %v239_v34, %v231_v12 }
  0x49   :  { %v105_v40 = vadd.f32 %v103_v37, %v85_v30  ;;  %v114_v41 = vsel %vm110_vm2, %v237_v32, %v112_v36 }
  0x4a   :  { %v116_v42 = vsub.f32 0.0, %v104_v38  ;;  %v115_v43 = vsel %vm111_vm3, %v239_v34, %v113_v39  ;;  %v135_v44 = vmul.f32 %v114_v41, %v70_v4 }
  0x4b   :  { %v117_v45 = vsub.f32 0.0, %v105_v40  ;;  %v136_v46 = vmul.f32 %v115_v43, %v71_v5  ;;  %v146_v47 = vadd.f32 %v115_v43, %v114_v41 }
  0x4c   :  { %v118_v48 = vmul.f32 1.442695, %v116_v42 }
  0x4d   :  { %v120_v49 = vmul.f32 1.442695, %v117_v45  ;;  %v142_v50 = vadd.f32 %v136_v46, %v135_v44  ;;  %197 = vst [vmem:[#allocation11 + $0x10] sm:$0xff] %v146_v47 }
  0x4e   :  { %240 = vpow2.f32 %v118_v48 }
  0x4f   :  { %242 = vpow2.f32 %v120_v49  ;;  %194 = vst [vmem:[#allocation11 + $0x8] sm:$0xff] %v142_v50 }
  0x58   :  { %v241_v51 = vpop.eup %240 }
  0x59   :  { %v243_v52 = vpop.eup %242  ;;  %v122_v53 = vsub.f32 1.0, %v241_v51 }
  0x5a   :  { %v123_v54 = vsub.f32 1.0, %v243_v52 }
  0x5b   :  { %v124_v55 = vmul.f32 %v122_v53, %v122_v53 }
  0x5c   :  { %v125_v56 = vmul.f32 %v123_v54, %v123_v54 }
  0x5d   :  { %v126_v57 = vmul.f32 %v124_v55, %v104_v38 }
  0x5e   :  { %v127_v58 = vmul.f32 %v125_v56, %v105_v40 }
  0x60   :  { %v138_v59 = vadd.f32 %v127_v58, %v126_v57 }
  0x62   :  { %191 = vst [vmem:[#allocation11] sm:$0xff] %v138_v59 }
  0x63   :  { %299 = shalt.err (!%p296_p6)
}
  0x64   :  { %s300_s10 = scalar_lea.hbm %s383_s2, 512 }
  0x65   :  { %p301_p7 = scmp.ne.s32.totalorder %s383_s2, %s300_s10  ;;  %p304_p8 = scmp.lt.u32.totalorder %s300_s10, %s383_s2 }
  0x67   :  { %p306_p9 = pnand %p304_p8, %p301_p7 }
  0x69   :  { %309 = shalt.err (!%p306_p9)
}
  0x6a   :  { %212 = dma.vmem_to_hbm [thread:$0]  %s207_s6, 512, %s383_s2, [#allocation8], %s317_s19, %s317_s19, %s318_s20  }
  0x6b   :  { %314 = dma.done.wait [#allocation8], 512  }
  0x6c   :  { %315 = vsyncadd [#allocation8], 4294966784 }
  0x6d   :  { %216 = vsyncpa [#allocation7], 1 }
  0x6e   :  { %217 = vsyncpa [#allocation10], 1 }
  0x6f   :  { %218 = vsyncpa [#allocation8], 1 }

</bundles_post_ra>
